<compile_context>
chip_gen: v7x
topology: tpu7x:2x2x1
jax: 0.10.0
libtpu: 0.0.40
codegen_flags: <defaults>
</compile_context>

<pallas_src>
import functools

import jax
import jax.numpy as jnp
from jax.experimental import pallas as pl
from jax.experimental.pallas import tpu as pltpu


# ---------------------------------------------------------------------------
# Kernel
# ---------------------------------------------------------------------------
def _pg_kernel(hits_ref, pgen_ref, vocab_ref, attn_ref, idx_ref, out_ref,
               *, tile_v, vocab_size, mxu_dtype):
    """Grid point = (batch b, vocab tile j); processes ALL T timesteps at once.

    hits_ref : (B, n_tiles) i32  SMEM  per-(batch, tile) attention-hit flags
    pgen_ref : (1, T, 1)    f32  VMEM  p_gen for batch b, all timesteps
    vocab_ref: (1, T, TV)   f32  VMEM  vocab-distribution lane tile (clamped map)
    attn_ref : (1, T, S)    f32  VMEM  attention distributions for batch b
    idx_ref  : (S, B)       i32  VMEM  extended-vocab ids of the source tokens
    out_ref  : (1, T, TV)   f32  VMEM  final-distribution lane tile
    """
    b = pl.program_id(0)
    j = pl.program_id(1)

    # Extended-vocab column ids covered by this lane tile.
    cols = j * tile_v + jax.lax.broadcasted_iota(jnp.int32, (1, tile_v), 1)

    pgen = pgen_ref[0]                                         # (T, 1)
    # Columns >= vocab_size carry no generator probability (OOV tail tiles /
    # clamped reads); the select also discards any boundary-pad garbage.
    vtile = jnp.where(cols < vocab_size, vocab_ref[0], 0.0)    # (T, TV)
    out_ref[0] = pgen * vtile                                  # generator term

    # Copy (pointer) term — only on tiles that actually receive attention mass.
    @pl.when(hits_ref[b, j] > 0)
    def _():
        scaled = (1.0 - pgen) * attn_ref[0]                    # (T, S)

        # Select column b of the (S, B) index matrix -> (S, 1) without any
        # 1-D reshapes (masked lane reduction, trivially small).
        idx_sb = idx_ref[...]                                  # (S, B) i32
        bsel = jax.lax.broadcasted_iota(jnp.int32, idx_sb.shape, 1) == b
        idx_col = jnp.sum(jnp.where(bsel, idx_sb, 0), axis=1, keepdims=True)

        # One-hot scatter matrix M[s, v] = [idx[b, s] == cols[v]] (exact 0/1,
        # also exact in bf16), amortized over all T timesteps via one MXU
        # matmul: proj[t, v] = sum_s scaled[t, s] * M[s, v].
        onehot = (idx_col == cols).astype(jnp.float32).astype(mxu_dtype)
        prec = (jax.lax.Precision.HIGHEST
                if jnp.dtype(mxu_dtype) == jnp.dtype(jnp.float32)
                else jax.lax.Precision.DEFAULT)
        proj = jnp.dot(scaled.astype(mxu_dtype), onehot,
                       preferred_element_type=jnp.float32,
                       precision=prec)                         # (T, TV) f32
        out_ref[0] = out_ref[0] + proj


# ---------------------------------------------------------------------------
# Wrapper (layout, hit flags, padding policy)
# ---------------------------------------------------------------------------
def pointer_generator_final_distribution(
    p_gen_list, vocab_distribution_list, attention_distribution_list,
    encoder_extended_vocab_input, oov_count, vocab_size, *,
    max_oov=None, tile_v=512, mxu_dtype=jnp.float32,
):
    """Returns a list (length T) of (B, vocab_size + max_oov) final distributions."""
    T = len(p_gen_list)
    # (B, T, feature) layout: timesteps pack the sublane dim, vocab is the lane dim.
    p_gen = jnp.stack(p_gen_list, axis=1).astype(jnp.float32)                # (B, T, 1)
    vocab = jnp.stack(vocab_distribution_list, axis=1).astype(jnp.float32)   # (B, T, V)
    attn = jnp.stack(attention_distribution_list, axis=1).astype(jnp.float32)  # (B, T, S)
    idx = encoder_extended_vocab_input.astype(jnp.int32)                     # (B, S)

    B, S = idx.shape
    V = vocab.shape[-1]
    assert V == vocab_size

    if max_oov is None:
        # TODO(synk): a data-dependent output width has no static-shape Pallas
        # equivalent; if not given statically, resolve on host (one sync).
        max_oov = int(jax.device_get(jnp.max(oov_count)))
    v_ext = vocab_size + int(max_oov)
    v_pad = ((v_ext + tile_v - 1) // tile_v) * tile_v
    n_tiles = v_pad // tile_v

    # Feed the vocab distribution directly (no (B, T, v_pad) zero-padded HBM
    # copy). Only if V is not a multiple of tile_v do we pad minimally so every
    # vocab block read is full; columns >= V are masked inside the kernel.
    v_pad_in = ((V + tile_v - 1) // tile_v) * tile_v
    if v_pad_in != V:
        vocab = jnp.pad(vocab, ((0, 0), (0, 0), (0, v_pad_in - V)))
    n_vtiles = v_pad_in // tile_v

    # Per-(batch, vocab-tile) hit flags -> scalar-prefetched into SMEM so the
    # kernel can skip the one-hot/MXU scatter on tiles with no attention mass.
    tile_of = idx // tile_v                                                  # (B, S)
    hits = jnp.any(tile_of[:, :, None] == jnp.arange(n_tiles)[None, None, :],
                   axis=1).astype(jnp.int32)                                 # (B, n_tiles)

    idx_t = idx.T                                                            # (S, B)

    kernel = functools.partial(_pg_kernel, tile_v=tile_v,
                               vocab_size=vocab_size, mxu_dtype=mxu_dtype)

    out = pl.pallas_call(
        kernel,
        out_shape=jax.ShapeDtypeStruct((B, T, v_pad), jnp.float32),
        grid_spec=pltpu.PrefetchScalarGridSpec(
            num_scalar_prefetch=1,
            grid=(B, n_tiles),
            in_specs=[
                # p_gen / attn / idx index_maps don't depend on j -> blocks stay
                # VMEM-resident across the whole inner vocab-tile loop.
                pl.BlockSpec((1, T, 1), lambda b, j, hits: (b, 0, 0)),
                pl.BlockSpec((1, T, tile_v),
                             lambda b, j, hits: (b, 0, jnp.minimum(j, n_vtiles - 1))),
                pl.BlockSpec((1, T, S), lambda b, j, hits: (b, 0, 0)),
                pl.BlockSpec((S, B), lambda b, j, hits: (0, 0)),
            ],
            out_specs=pl.BlockSpec((1, T, tile_v), lambda b, j, hits: (b, 0, j)),
        ),
        # Both axes independent; leading parallel axis (batch) feeds the v7x
        # second TensorCore. Raise vmem_limit_bytes only if tile_v*T*4*~10 > 32MiB.
        compiler_params=pltpu.CompilerParams(
            dimension_semantics=("parallel", "parallel")),
    )(hits, p_gen, vocab, attn, idx_t)

    out = out[:, :, :v_ext]
    return [out[:, t, :] for t in range(T)]


# ---------------------------------------------------------------------------
# Pure-JAX reference (mirrors the PyTorch scatter-add semantics exactly)
# ---------------------------------------------------------------------------
def reference_final_distribution(p_gen_list, vocab_list, attn_list, idx,
                                 max_oov, vocab_size):
    v_ext = vocab_size + max_oov
    B = idx.shape[0]
    outs = []
    for p_gen, vocab, attn in zip(p_gen_list, vocab_list, attn_list):
        vg = p_gen * vocab                          # (B, V)
        ag = (1.0 - p_gen) * attn                   # (B, S)
        ve = jnp.concatenate([vg, jnp.zeros((B, max_oov), vg.dtype)], axis=1)
        proj = jnp.zeros((B, v_ext), vg.dtype).at[
            jnp.arange(B)[:, None], idx].add(ag)
        outs.append(ve + proj)
    return outs


# ---------------------------------------------------------------------------
# Demo / self-test
# ---------------------------------------------------------------------------
if __name__ == "__main__":
    key = jax.random.PRNGKey(0)

    # Module config: the embedding layer only contributes num_embeddings.
    VOCAB_SIZE = 1024     # embedding_layer.num_embeddings
    EMBED_DIM = 32        # embedding_layer.embedding_dim (unused in this step)
    B, S, T = 4, 16, 8    # batch, source seq len, decoder steps (T fills 8 sublanes)
    TILE_V = 512

    # Synthetic embedding weights only to mirror the module's __init__ shapes.
    key, k_emb = jax.random.split(key)
    _embedding_weight = jax.random.normal(k_emb, (VOCAB_SIZE, EMBED_DIM),
                                          jnp.float32)

    oov_count = jnp.array([3, 17, 100, 60], dtype=jnp.int32)  # per-batch OOV counts
    MAX_OOV = 100                                             # static -> no host sync
    ext_vocab = VOCAB_SIZE + MAX_OOV

    p_gen_list, vocab_list, attn_list = [], [], []
    for _ in range(T):
        key, k1, k2, k3 = jax.random.split(key, 4)
        p_gen_list.append(jax.nn.sigmoid(jax.random.normal(k1, (B, 1))))
        vocab_list.append(jax.nn.softmax(jax.random.normal(k2, (B, VOCAB_SIZE)),
                                         axis=-1))
        attn_list.append(jax.nn.softmax(jax.random.normal(k3, (B, S)), axis=-1))

    key, k_idx = jax.random.split(key)
    encoder_extended_vocab_input = jax.random.randint(
        k_idx, (B, S), 0, ext_vocab, dtype=jnp.int32)
    # Batch 0 only points at low ids -> some vocab tiles get no attention mass,
    # exercising the pl.when tile-skip path.
    encoder_extended_vocab_input = encoder_extended_vocab_input.at[0].set(
        encoder_extended_vocab_input[0] % 97)
    # Guard (reviewer note): ids must lie inside the extended vocab.
    assert int(jnp.max(encoder_extended_vocab_input)) < ext_vocab

    ref_list = reference_final_distribution(
        p_gen_list, vocab_list, attn_list,
        encoder_extended_vocab_input, MAX_OOV, VOCAB_SIZE)

    # 1) Exact path: f32 MXU operands.
    out_list = pointer_generator_final_distribution(
        p_gen_list, vocab_list, attn_list,
        encoder_extended_vocab_input, oov_count, VOCAB_SIZE,
        max_oov=MAX_OOV, tile_v=TILE_V, mxu_dtype=jnp.float32)
    out_list = [jax.block_until_ready(o) for o in out_list]
    for o, r in zip(out_list, ref_list):
        assert o.shape == (B, ext_vocab), o.shape
        assert jnp.allclose(o, r, rtol=1e-4, atol=1e-5), float(jnp.abs(o - r).max())

    # 2) v6e/v7x-friendly path: bf16 MXU operands (one-hot exact, attention
    #    weights rounded to bf16), f32 accumulation.
    out_bf16 = pointer_generator_final_distribution(
        p_gen_list, vocab_list, attn_list,
        encoder_extended_vocab_input, oov_count, VOCAB_SIZE,
        max_oov=MAX_OOV, tile_v=TILE_V, mxu_dtype=jnp.bfloat16)
    out_bf16 = [jax.block_until_ready(o) for o in out_bf16]
    for o, r in zip(out_bf16, ref_list):
        assert o.shape == (B, ext_vocab), o.shape
        assert jnp.allclose(o, r, rtol=2e-2, atol=2e-3), float(jnp.abs(o - r).max())

    print("KERNEL_OK")
</pallas_src>

<mosaic_0001>
module attributes {stable_mosaic.version = 11 : i64} {
  func.func @_pg_kernel(%arg0: i32, %arg1: i32, %arg2: memref<4x3xi32, #tpu.memory_space<smem>>, %arg3: memref<1x8x1xf32, #tpu.memory_space<vmem>>, %arg4: memref<1x8x512xf32, #tpu.memory_space<vmem>>, %arg5: memref<1x8x16xf32, #tpu.memory_space<vmem>>, %arg6: memref<16x4xi32, #tpu.memory_space<vmem>>, %arg7: memref<1x8x512xf32, #tpu.memory_space<vmem>>) attributes {dimension_semantics = [#tpu.dimension_semantics<parallel>, #tpu.dimension_semantics<parallel>], iteration_bounds = array<i64: 4, 3>, scalar_prefetch = 1 : i64, scratch_operands = 0 : i64, tpu.core_type = #tpu.core_type<tc>, window_params = [{transform_indices = @transform_0, window_bounds = array<i64: 1, 8, 1>}, {transform_indices = @transform_1, window_bounds = array<i64: 1, 8, 512>}, {transform_indices = @transform_2, window_bounds = array<i64: 1, 8, 16>}, {pipeline_mode = #tpu.pipeline_mode<synchronous>, transform_indices = @transform_3, window_bounds = array<i64: 16, 4>}, {transform_indices = @transform_4, window_bounds = array<i64: 1, 8, 512>}]} {
    %c512_i32 = arith.constant 512 : i32
    %0 = arith.muli %arg1, %c512_i32 : i32
    %1 = tpu.iota {dimensions = array<i32: 1>} : vector<1x512xi32>
    %2 = vector.broadcast %0 : i32 to vector<1x512xi32>
    %3 = arith.addi %2, %1 : vector<1x512xi32>
    %c0 = arith.constant 0 : index
    %c0_0 = arith.constant 0 : index
    %c0_1 = arith.constant 0 : index
    %4 = vector.load %arg3[%c0, %c0_0, %c0_1] : memref<1x8x1xf32, #tpu.memory_space<vmem>>, vector<1x8x1xf32>
    %5 = vector.shape_cast %4 : vector<1x8x1xf32> to vector<8x1xf32>
    %c1024_i32 = arith.constant 1024 : i32
    %6 = vector.broadcast %c1024_i32 : i32 to vector<1x512xi32>
    %7 = arith.cmpi slt, %3, %6 : vector<1x512xi32>
    %c0_2 = arith.constant 0 : index
    %c0_3 = arith.constant 0 : index
    %c0_4 = arith.constant 0 : index
    %8 = vector.load %arg4[%c0_2, %c0_3, %c0_4] : memref<1x8x512xf32, #tpu.memory_space<vmem>>, vector<1x8x512xf32>
    %9 = vector.shape_cast %8 : vector<1x8x512xf32> to vector<8x512xf32>
    %cst = arith.constant 0.000000e+00 : f32
    %10 = vector.shape_cast %7 : vector<1x512xi1> to vector<1x512xi1>
    %11 = vector.broadcast %10 : vector<1x512xi1> to vector<8x512xi1>
    %12 = vector.broadcast %cst : f32 to vector<8x512xf32>
    %13 = arith.select %11, %9, %12 : vector<8x512xi1>, vector<8x512xf32>
    %14 = vector.broadcast %5 : vector<8x1xf32> to vector<8x512xf32>
    %15 = arith.mulf %14, %13 : vector<8x512xf32>
    %c0_5 = arith.constant 0 : index
    %c0_6 = arith.constant 0 : index
    %c0_7 = arith.constant 0 : index
    %16 = vector.load %arg7[%c0_5, %c0_6, %c0_7] : memref<1x8x512xf32, #tpu.memory_space<vmem>>, vector<1x8x512xf32>
    %17 = vector.shape_cast %16 : vector<1x8x512xf32> to vector<8x512xf32>
    %18 = vector.shape_cast %15 : vector<8x512xf32> to vector<1x8x512xf32>
    tpu.vector_store %arg7[%c0_5, %c0_6, %c0_7], %18 {strides = array<i32>} : memref<1x8x512xf32, #tpu.memory_space<vmem>>, vector<1x8x512xf32>,
    %19 = arith.index_cast %arg0 : i32 to index
    %20 = arith.index_cast %arg1 : i32 to index
    %21 = memref.load %arg2[%19, %20] : memref<4x3xi32, #tpu.memory_space<smem>>
    %c0_i32 = arith.constant 0 : i32
    %22 = arith.cmpi sgt, %21, %c0_i32 : i32
    %23 = arith.extui %22 : i1 to i32
    %c0_i32_8 = arith.constant 0 : i32
    %24 = arith.cmpi ne, %23, %c0_i32_8 : i32
    scf.if %24 {
      %cst_9 = arith.constant 1.000000e+00 : f32
      %25 = vector.broadcast %cst_9 : f32 to vector<8x1xf32>
      %26 = arith.subf %25, %5 : vector<8x1xf32>
      %c0_10 = arith.constant 0 : index
      %c0_11 = arith.constant 0 : index
      %c0_12 = arith.constant 0 : index
      %27 = vector.load %arg5[%c0_10, %c0_11, %c0_12] : memref<1x8x16xf32, #tpu.memory_space<vmem>>, vector<1x8x16xf32>
      %28 = vector.shape_cast %27 : vector<1x8x16xf32> to vector<8x16xf32>
      %29 = vector.broadcast %26 : vector<8x1xf32> to vector<8x16xf32>
      %30 = arith.mulf %29, %28 : vector<8x16xf32>
      %c0_13 = arith.constant 0 : index
      %c0_14 = arith.constant 0 : index
      %31 = vector.load %arg6[%c0_13, %c0_14] : memref<16x4xi32, #tpu.memory_space<vmem>>, vector<16x4xi32>
      %32 = tpu.iota {dimensions = array<i32: 1>} : vector<16x4xi32>
      %33 = vector.broadcast %arg0 : i32 to vector<16x4xi32>
      %34 = arith.cmpi eq, %32, %33 : vector<16x4xi32>
      %c0_i32_15 = arith.constant 0 : i32
      %35 = vector.broadcast %c0_i32_15 : i32 to vector<16x4xi32>
      %36 = arith.select %34, %31, %35 : vector<16x4xi1>, vector<16x4xi32>
      %cst_16 = arith.constant dense<0> : vector<16xi32>
      %37 = vector.multi_reduction <add>, %36, %cst_16 [1] : vector<16x4xi32> to vector<16xi32>
      %38 = vector.shape_cast %37 : vector<16xi32> to vector<16x1xi32>
      %39 = vector.broadcast %38 : vector<16x1xi32> to vector<16x512xi32>
      %40 = vector.broadcast %3 : vector<1x512xi32> to vector<16x512xi32>
      %41 = arith.cmpi eq, %39, %40 : vector<16x512xi32>
      %42 = arith.extui %41 : vector<16x512xi1> to vector<16x512xi32>
      %43 = arith.sitofp %42 : vector<16x512xi32> to vector<16x512xf32>
      %cst_17 = arith.constant dense<0.000000e+00> : vector<8x512xf32>
      %44 = tpu.matmul %30, %43, %cst_17 {dimension_numbers = #tpu.dot_dimension_numbers<[1], [0], [0], [1], [0, 0, 1, 1], [], []>, precision = #tpu.contract_precision<fp32>} : vector<8x16xf32>, vector<16x512xf32>, vector<8x512xf32> -> vector<8x512xf32>
      %c0_18 = arith.constant 0 : index
      %c0_19 = arith.constant 0 : index
      %c0_20 = arith.constant 0 : index
      %45 = vector.load %arg7[%c0_18, %c0_19, %c0_20] : memref<1x8x512xf32, #tpu.memory_space<vmem>>, vector<1x8x512xf32>
      %46 = vector.shape_cast %45 : vector<1x8x512xf32> to vector<8x512xf32>
      %47 = arith.addf %46, %44 : vector<8x512xf32>
      %c0_21 = arith.constant 0 : index
      %c0_22 = arith.constant 0 : index
      %c0_23 = arith.constant 0 : index
      %48 = vector.load %arg7[%c0_21, %c0_22, %c0_23] : memref<1x8x512xf32, #tpu.memory_space<vmem>>, vector<1x8x512xf32>
      %49 = vector.shape_cast %48 : vector<1x8x512xf32> to vector<8x512xf32>
      %50 = vector.shape_cast %47 : vector<8x512xf32> to vector<1x8x512xf32>
      tpu.vector_store %arg7[%c0_21, %c0_22, %c0_23], %50 {strides = array<i32>} : memref<1x8x512xf32, #tpu.memory_space<vmem>>, vector<1x8x512xf32>,
    } else {
    }
    return
  }
  func.func @transform_0(%arg0: i32, %arg1: i32, %arg2: memref<4x3xi32, #tpu.memory_space<smem>>) -> (i32, i32, i32) {
    %c0_i32 = arith.constant 0 : i32
    %c0_i32_0 = arith.constant 0 : i32
    %c0_i32_1 = arith.constant 0 : i32
    return %arg0, %c0_i32, %c0_i32_0 : i32, i32, i32
  }
  func.func @transform_1(%arg0: i32, %arg1: i32, %arg2: memref<4x3xi32, #tpu.memory_space<smem>>) -> (i32, i32, i32) {
    %c1_i32 = arith.constant 1 : i32
    %0 = arith.minsi %arg1, %c1_i32 : i32
    %c0_i32 = arith.constant 0 : i32
    %c0_i32_0 = arith.constant 0 : i32
    return %arg0, %c0_i32, %0 : i32, i32, i32
  }
  func.func @transform_2(%arg0: i32, %arg1: i32, %arg2: memref<4x3xi32, #tpu.memory_space<smem>>) -> (i32, i32, i32) {
    %c0_i32 = arith.constant 0 : i32
    %c0_i32_0 = arith.constant 0 : i32
    %c0_i32_1 = arith.constant 0 : i32
    return %arg0, %c0_i32, %c0_i32_0 : i32, i32, i32
  }
  func.func @transform_3(%arg0: i32, %arg1: i32, %arg2: memref<4x3xi32, #tpu.memory_space<smem>>) -> (i32, i32) {
    %c0_i32 = arith.constant 0 : i32
    %c0_i32_0 = arith.constant 0 : i32
    %c0_i32_1 = arith.constant 0 : i32
    return %c0_i32, %c0_i32_0 : i32, i32
  }
  func.func @transform_4(%arg0: i32, %arg1: i32, %arg2: memref<4x3xi32, #tpu.memory_space<smem>>) -> (i32, i32, i32) {
    %c0_i32 = arith.constant 0 : i32
    %c0_i32_0 = arith.constant 0 : i32
    return %arg0, %c0_i32, %arg1 : i32, i32, i32
  }
}

</mosaic_0001>

<bundles_post_ra>
// kernel: tpu_custom_call.1
= control target key start
LH: loop header
LB: loop body
LE: loop exit
PB: predicated region body
PF: predicated region fallthrough
CT: control target
= control target key end

     0   :  { %s2422_s0 = inlined_call_operand.vmem [shape: s32[4,3], index: 0, kind: input, shape index: {}]   ;;  %s2423_s1 = inlined_call_operand.vmem [shape: f32[4,8,1], index: 1, kind: input, shape index: {}]   ;;  %s2424_s2 = inlined_call_operand.hbm [shape: f32[4,8,1024], index: 2, kind: input, shape index: {}]   ;;  %s2425_s3 = inlined_call_operand.vmem [shape: f32[4,8,16], index: 3, kind: input, shape index: {}]   ;;  %s2426_s4 = inlined_call_operand.vmem [shape: s32[16,4], index: 4, kind: input, shape index: {}]   ;;  %s2427_s5 = inlined_call_operand.hbm [shape: f32[4,8,1536], index: 5, kind: output, shape index: {}]  }
   0x1   :  { %s10_s20 = sshll.u32 %s2422_s0, 4  ;;  %s11_s20 = int_to_ptr.vmem [resolvable:$true] %s10_s20 }
   0x2   :  { %s1762_s21 = scalar_lea.vmem %s11_s20, 64  ;;  %p1767_p1 = scmp.lt.s32.totalorder %s11_s20, %s11_s20 }
   0x3   :  { %p1763_p0 = scmp.ne.s32.totalorder %s11_s20, %s1762_s21  ;;  %p1768_p2 = scmp.lt.s32.totalorder %s1762_s21, %s1762_s21 }
   0x5   :  { %p1769_p3 = por %p1768_p2, %p1767_p1 }
   0x7   :  { %p1770_p4 = pnand %p1769_p3, %p1763_p0 }
   0x9   :  { %1773 = shalt.err (!%p1770_p4)  }
   0xa   :  { %s1930_s22 = smov [#allocation3]  }
   0xb   :  { %13 = dma.vmem_to_smem %s11_s20, 64, %s1930_s22, [#allocation2] }
   0xc   :  { %1876 = dma.done.wait [#allocation2], 64 }
   0xd   :  { %1877 = vsyncadd [#allocation2], 4294967232 }
   0xe   :  { %15 = sfence }
   0xf   :  { %16 = vsyncpa [#allocation5], 0 }
  0x10   :  { %18 = vsyncpa [#allocation5 + $0x1], 0 }
  0x11   :  { %19 = vsyncpa [#allocation6], 0 }
  0x12   :  { %21 = vsyncpa [#allocation6 + $0x1], 0  ;;  %s1970_s23 = smov 0   ;;  %s1972_s0 = smov 0  }
  0x13   :  { %s1974_s24 = smov 0   ;;  %s1976_s25 = smov 0  }
  0x14   :  { %s1978_s26 = smov 0   ;;  %s1980_s27 = smov 0  }
  0x15   :  { %s1982_s28 = smov 0   ;;  %s1984_s29 = smov 0  }
  0x16   :  { %s1986_s30 = smov 0   ;;  %s1988_s6 = smov 0  }
  0x17   :  { %s1990_s7 = smov 0  }
  0x18 LB: > { %2433 = sst [smem:[#allocation11_spill]] %s1908_s27  ;;  %s1531_s8 = sadd.s32 4294967295, %s1928_s7   ;;  %s1928_s7 = sphi %s1990_s7, %s27_s7   ;;  %s1924_s6 = sphi %s1988_s6, %s2466_s6   ;;  %s1920_s30 = sphi %s1986_s30, %s2458_s30   ;;  %s1916_s29 = sphi %s1984_s29, %s2465_s29   ;;  %s1912_s28 = sphi %s1982_s28, %s2457_s28   ;;  %s1908_s27 = sphi %s1980_s27, %s2456_s27   ;;  %s1904_s26 = sphi %s1978_s26, %s2464_s26   ;;  %s1900_s25 = sphi %s1976_s25, %s2463_s25   ;;  %s1896_s24 = sphi %s1974_s24, %s2462_s24   ;;  %s1892_s0 = sphi %s1972_s0, %s2461_s0   ;;  %s1888_s23 = sphi %s1970_s23, %s2460_s23  }
  0x19   : > { %2434 = sst [smem:[#allocation12_spill]] %s1920_s30  ;;  %s1532_s9 = sadd.s32 4294967294, %s1928_s7  }
  0x1a   : > { %s36_s10 = sadd.s32 1, %s1920_s30  ;;  %s39_s11 = sadd.s32 1, %s1924_s6 }
  0x1b   : > { %p37_p5 = scmp.ge.s32.totalorder %s36_s10, 3  ;;  %p69_p6 = scmp.lt.s32.totalorder %s1920_s30, 1 }
  0x1c   : > { %s78_s12 = sadd.s32 1, %s1908_s27  ;;  %p85_p7 = scmp.ne.s32.totalorder %s1908_s27, %s1904_s26 }
  0x1d   : > { %s2468_s10 = smov (%p37_p5, %s36_s10), 0  ;;  %s2470_s11 = smov (!%p37_p5, %s39_s11), %s1924_s6 }
  0x1e   : > { %2435 = sst [smem:[#allocation13_spill]] %s2468_s10  ;;  %p41_p8 = scmp.ge.s32.totalorder %s2470_s11, 4 }
  0x1f   : > { %s2037_s13 = scalar_select %p69_p6, %s1920_s30, 1 }
  0x20   : > { %p71_p9 = scmp.lt.s32.totalorder %s2468_s10, 1  ;;  %p86_p10 = scmp.eq.s32.totalorder %s1928_s7, 0 }
  0x21   : > { %p91_p11 = scmp.ne.s32.totalorder %s1904_s26, %s1900_s25  ;;  %s2472_s11 = smov (%p41_p8, %s2470_s11), 0 }
  0x22   : > { %2436 = sst [smem:[#allocation14_spill]] %s2472_s11  ;;  %s73_s15 = ssub.s32 %s1924_s6, %s2472_s11 }
  0x23   : > { %s72_s14 = scalar_select %p71_p9, %s2468_s10, 1 }
  0x24   : > { %p2048_p12 = por %p86_p10, %p85_p7  ;;  %p92_p13 = scmp.eq.s32.totalorder %s1531_s8, 0 }
  0x25   : > { %s74_s17 = ssub.s32 %s2037_s13, %s72_s14  ;;  %s149_s19 = ssub.s32 %s1920_s30, %s2468_s10 }
  0x26   : > { %s75_s18 = sor.u32 %s74_s17, %s73_s15  ;;  %p2057_p1 = por %p92_p13, %p91_p11 }
  0x27   : > { %p76_p0 = scmp.eq.s32.totalorder %s75_s18, 0  ;;  %s150_s21 = sor.u32 %s149_s19, %s73_s15 }
  0x28   : > { %s153_s22 = sadd.s32 1, %s1896_s24  ;;  %p151_p2 = scmp.eq.s32.totalorder %s150_s21, 0 }
  0x29   : > { %s2063_s25 = scalar_select %p76_p0, %s1908_s27, %s78_s12  }
  0x2a   : > { %p163_p3 = scmp.ne.s32.totalorder %s1896_s24, %s1892_s0  ;;  %p164_p4 = scmp.eq.s32.totalorder %s1531_s8, 11 }
  0x2b   : > { %2439 = sst [smem:[#allocation15_spill]] %s2063_s25  ;;  %p169_p5 = scmp.ne.s32.totalorder %s1892_s0, %s1888_s23 }
  0x2c   : > { %s2072_s14 = scalar_select %p151_p2, %s1896_s24, %s153_s22  }
  0x2d   : > { %p2074_p6 = por %p164_p4, %p163_p3  ;;  %p170_p7 = scmp.eq.s32.totalorder %s1532_s9, 11 }
  0x2e   : > { %p1665_p8 = scmp.lt.s32.totalorder %s1928_s7, 12  ;;  %s200_s15 = sand.u32 1, %s1908_s27  }
  0x2f   : > { %s2440_s17 = scalar_select %p2074_p6, 1, 0 }
  0x30   : > { %p2081_p9 = por %p170_p7, %p169_p5  ;;  %s1535_s18 = sshll.u32 %s200_s15, 5 }
  0x31   : > { %s1536_s8 = sshll.u32 %s2037_s13, 2  ;;  %s1537_s19 = sshll.u32 %s1924_s6, 3 }
  0x32   : > { %s2441_s12 = scalar_select %p2081_p9, 1, 0 }
  0x33   : > { %s204_s21 = scalar_lea.vmem [#allocation4], %s1535_s18  ;;  %s212_s11 = sadd.s32 %s1537_s19, %s1536_s8 }
  0x34   : > { %s216_s22 = sshll.u32 %s204_s21, 4  ;;  %s1538_s10 = sshll.u32 %s212_s11, 7  ;;  %s2088_s22 = int_to_ptr.vmem [resolvable:$true] %s216_s22 }
  0x35   : > { %p2092_p10 = pnand %p1665_p8, %p2048_p12  ;;  %s2099_s27 = scalar_lea.hbm %s2424_s2, %s1538_s10 }
  0x36   : > { %s201_s13 = scalar_lea.sflag [#allocation5], %s200_s15  ;;  %s1774_s11 = scalar_lea.hbm %s2099_s27, 512 }
  0x37   : > { %p1775_p0 = scmp.ne.s32.totalorder %s2099_s27, %s1774_s11  ;;  %p1776_p12 = pneg %p2092_p10 }
  0x38   : > { %s1779_s10 = scalar_lea.hbm %s2424_s2, 4096  ;;  %p1780_p4 = scmp.lt.u32.totalorder %s2099_s27, %s2424_s2 }
  0x39   : > { %p1777_p2 = pnand %p1776_p12, %p1775_p0  ;;  %p1781_p5 = scmp.lt.u32.totalorder %s1779_s10, %s1774_s11 }
  0x3a   : > { %p1783_p8 = scmp.lt.u32.totalorder %s1774_s11, %s2099_s27 }
  0x3b   : > { %p1778_p3 = pneg %p1777_p2  ;;  %p1782_p7 = por %p1781_p5, %p1780_p4 }
  0x3d   : > { %p1784_p11 = por %p1783_p8, %p1782_p7 }
  0x3f   : > { %p1785_p13 = pnand %p1784_p11, %p1778_p3 }
  0x41   : > { %1788 = shalt.err (!%p1785_p13)
}
  0x42   : > { %s1789_s15 = scalar_lea.vmem %s2088_s22, 512  ;;  %s1931_s19 = smov [#allocation4]  }
  0x43   : > { %p1790_p0 = scmp.ne.s32.totalorder %s2088_s22, %s1789_s15  ;;  %s1794_s21 = sshll.u32 %s1931_s19, 4  ;;  %s1795_s21 = int_to_ptr.vmem [resolvable:$false] %s1794_s21 }
  0x44   : > { %s1796_s9 = scalar_lea.vmem %s1795_s21, 1024  ;;  %p1797_p6 = scmp.lt.s32.totalorder %s2088_s22, %s1795_s21 }
  0x45   : > { %p1792_p2 = pnand %p1790_p0, %p1776_p12  ;;  %p1798_p4 = scmp.lt.s32.totalorder %s1796_s9, %s1789_s15 }
  0x47   : > { %p1793_p9 = pneg %p1792_p2  ;;  %p1799_p5 = por %p1798_p4, %p1797_p6 }
  0x49   : > { %p1800_p7 = pnand %p1799_p5, %p1793_p9 }
  0x4b   : > { %1803 = shalt.err (!%p1800_p7)
}
  0x4c   : > { %1660 = dma.hbm_to_vmem [thread:$0]  (!%p2092_p10), %s2099_s27, 512, %s2088_s22, %s201_s13  }
  0x4d   : > { %p2443_p11 = scmp.lt.s32.totalorder %s1928_s7, 13  ;;  %p2444_p13 = scmp.ge.s32.totalorder %s1928_s7, 1 }
  0x4f   : > { %p229_p12 = pnand %p2444_p13, %p2443_p11 }
  0x50   : > { %s234_s11 = sand.u32 (!%p229_p12), 1, %s1904_s26  }
  0x51   : > { %232 = sbr.rel (%p229_p12) target bundleno = 580 (0x244), region = 36  ;;  %s1540_s16 = sshll.u32 (!%p229_p12), %s234_s11, 5 }
  0x52   : > { %s235_s25 = scalar_lea.sflag (!%p229_p12), [#allocation5], %s234_s11  ;;  %s2133_s10 = scalar_lea.vmem (!%p229_p12), [#allocation4], %s1540_s16 }
  0x58   : > { %1879 = dma.done.wait (%p2057_p1), %s235_s25, 512  }
  0x59   : > { %1881 = vsyncadd (%p2057_p1), %s235_s25, 4294966784  ;;  %s328_s27 = sshra.s32 %s1912_s28, 7  ;;  %s333_s30 = sand.u32 127, %s1912_s28  ;;  %v1932_v0 = vmov 0   ;;  %v284_v2 = vlaneseq  ;;  %v299_v12 = vld [vmem:[%s2133_s10] sm:$0xff]  ;;  %v300_v13 = vld [vmem:[%s2133_s10 + $0x8] sm:$0xff] }
  0x5a   : > { %s330_s22 = sadd.s32 %s1916_s29, %s328_s27  ;;  %1760 = vset.pattern.permute.xlu0 %v1932_v0  ;;  %p271_p6 = scmp.lt.s32.totalorder %s1916_s29, 3  ;;  %v301_v14 = vld [vmem:[%s2133_s10 + $0x10] sm:$0xff]  ;;  %v302_v15 = vld [vmem:[%s2133_s10 + $0x18] sm:$0xff] }
  0x5b   : > { %s1545_s13 = sshll.u32 %s330_s22, 7  ;;  %v285_v3 = vand.u32 127, %v284_v2  ;;  %s1544_s27 = sshll.u32 %s1912_s28, 9 }
  0x5c   : > { %s334_s18 = sadd.s32 %s1545_s13, %s333_s30  ;;  %v289_v7 = vstv %s1544_s27  ;;  %s268_s30 = sand.u32 1, %s1892_s0  }
  0x5d   : > { %s2143_s8 = sld [smem:[#allocation3 + %s334_s18]]  ;;  %v286_v4 = vadd.s32 128, %v285_v3  ;;  %v287_v5 = vadd.s32 256, %v285_v3  ;;  %v288_v6 = vadd.s32 384, %v285_v3  ;;  %v2158_v8 = vadd.s32 %v289_v7, %v285_v3  ;;  %s1541_s22 = sshll.u32 %s268_s30, 5 }
  0x5e   : > { %s272_s15 = scalar_select %p271_p6, %s1916_s29, 3 }
  0x5f   : > { %v2160_v9 = vadd.s32 %v289_v7, %v286_v4  ;;  %v2162_v10 = vadd.s32 %v289_v7, %v287_v5  ;;  %v2164_v11 = vadd.s32 %v289_v7, %v288_v6  ;;  %vm295_vm0 = vcmp.lt.s32.totalorder %v2158_v8, 1024  ;;  %s2177_s13 = scalar_lea.vmem [#allocation7], %s1541_s22 }
  0x60   : > { %s1542_s19 = sshll.u32 %s272_s15, 3  ;;  %v311_v16 = vsel %vm295_vm0, %v299_v12, 0.0 }
  0x61   : > { %s274_s9 = scalar_lea.vmem %s2423_s1, %s1542_s19  ;;  %s2152_s25 = scalar_lea.vmem %s2425_s3, %s1542_s19  ;;  %vm296_vm1 = vcmp.lt.s32.totalorder %v2160_v9, 1024  ;;  %vm297_vm2 = vcmp.lt.s32.totalorder %v2162_v10, 1024  ;;  %vm298_vm3 = vcmp.lt.s32.totalorder %v2164_v11, 1024 }
  0x62   : > { %v2154_v1 = vld [vmem:[%s274_s9] sm:$0xff]  ;;  %v312_v17 = vsel %vm296_vm1, %v300_v13, 0.0  ;;  %v313_v18 = vsel %vm297_vm2, %v301_v14, 0.0  ;;  %v314_v19 = vsel %vm298_vm3, %v302_v15, 0.0 }
  0x63   : > { %317 = vperm.xlu0 %1760, %v2154_v1   ;;  %p1546_p1 = scmp.le.s32.totalorder %s2143_s8, 0 }
  0x64   : > { %v348_v25 = vld [vmem:[%s2426_s4] sm:$0xff] (!%p1546_p1)  ;;  %v350_v26 = vstv (!%p1546_p1), %s1916_s29  ;;  %vm354_vm4 = vcmask (!%p1546_p1), 31744   ;;  %v349_v27 = vld [vmem:[%s2426_s4 + $0x8] sm:$0xff] (!%p1546_p1)  ;;  %v1933_v28 = vmov (!%p1546_p1), 0   ;;  %v1934_v41 = vmov (!%p1546_p1), 0.0  }
  0x65   : > { %vm351_vm5 = vcmp.eq.s32.totalorder (!%p1546_p1), %v285_v3, %v350_v26  ;;  %477 = vmatprep.mubr.f32.mxu0 (!%p1546_p1), %v1934_v41  ;;  %968 = vmatprep.mubr.f32.mxu1 (!%p1546_p1), %v1934_v41  ;;  %v340_v42 = vsub.f32 (!%p1546_p1), 1.0, %v2154_v1  ;;  %vm405_vm10 = vcmask (!%p1546_p1), 130048   ;;  %v341_v58 = vld [vmem:[%s2152_s25] sm:$0xff] (!%p1546_p1)  ;;  %v1935_v5 = vmov (!%p1546_p1), 1.0|1.0  }
  0x66   : > { %v352_v29 = vsel (!%p1546_p1), %vm351_vm5, %v348_v25, 0  ;;  %v353_v30 = vsel (!%p1546_p1), %vm351_vm5, %v349_v27, 0 }
  0x67   : > { %1761 = vset.pattern.permute.xlu0 (!%p1546_p1), %v1933_v28  ;;  %v355_v31 = vsel (!%p1546_p1), %vm354_vm4, %v352_v29, 0  ;;  %v368_v32 = vsel (!%p1546_p1), %vm354_vm4, %v353_v30, 0 }
  0x68   : > { %v357_v33 = vshrl.u32 (!%p1546_p1), %v355_v31, 16  ;;  %v356_v34 = vand.u32 (!%p1546_p1), 65535, %v355_v31  ;;  %v370_v35 = vshrl.u32 (!%p1546_p1), %v368_v32, 16  ;;  %v369_v36 = vand.u32 (!%p1546_p1), 65535, %v368_v32 }
  0x6a   : > { %v359_v37 = vcvt.s32.f32 (!%p1546_p1), %v357_v33  ;;  %v358_v38 = vcvt.s32.f32 (!%p1546_p1), %v356_v34  ;;  %v372_v39 = vcvt.s32.f32 (!%p1546_p1), %v370_v35  ;;  %v371_v40 = vcvt.s32.f32 (!%p1546_p1), %v369_v36 }
  0x6c   : > { %360 = vadd.xlane.f32.xlu1 (!%p1546_p1), %v358_v38 }
  0x70   : > { %373 = vadd.xlane.f32.xlu1 (!%p1546_p1), %v371_v40 }
  0x82   : > { %362 = vadd.xlane.f32.xlu0 (!%p1546_p1), %v359_v37 }
  0x86   : > { %375 = vadd.xlane.f32.xlu0 (!%p1546_p1), %v372_v39 }
  0x9c   : > { %344 = vperm.xlu0 (!%p1546_p1), %1761, %v340_v42  }
  0xe0   : > { %339 = sbr.rel (%p1546_p1) target bundleno = 553 (0x229), region = 44 }
  0xe2   : > { %v318_v20 = vpop.permute.xlu0 %317 }
  0xe3   : > { %v320_v21 = vmul.f32 %v318_v20, %v311_v16  ;;  %v321_v22 = vmul.f32 %v318_v20, %v312_v17  ;;  %v322_v23 = vmul.f32 %v318_v20, %v313_v18  ;;  %v323_v24 = vmul.f32 %v318_v20, %v314_v19 }
  0xe5   : > { %324 = vst [vmem:[%s2177_s13] sm:$0xff] %v320_v21  ;;  %325 = vst [vmem:[%s2177_s13 + $0x8] sm:$0xff] %v321_v22 }
  0xe6   : > { %326 = vst [vmem:[%s2177_s13 + $0x10] sm:$0xff] %v322_v23  ;;  %327 = vst [vmem:[%s2177_s13 + $0x18] sm:$0xff] %v323_v24 }
  0xf9   : > { %v361_v44 = vpop.xlane.xlu1 %360 }
  0xfa   : > { %v364_v46 = vcvt.f32.s32 %v361_v44 }
  0xfd   : > { %v374_v49 = vpop.xlane.xlu1 %373 }
  0xfe   : > { %v377_v52 = vcvt.f32.s32 %v374_v49 }
 0x10f   : > { %v363_v43 = vpop.xlane.xlu0 %362 }
 0x110   : > { %v365_v45 = vcvt.f32.s32 %v363_v43 }
 0x112   : > { %v366_v47 = vshll.u32 %v365_v45, 16 }
 0x113   : > { %v376_v48 = vpop.xlane.xlu0 %375 }
 0x114   : > { %v367_v50 = vadd.s32 %v366_v47, %v364_v46  ;;  %v378_v51 = vcvt.f32.s32 %v376_v48 }
 0x116   : > { %v379_v53 = vshll.u32 %v378_v51, 16  ;;  %vm382_vm6 = vcmp.eq.s32.totalorder %v367_v50, %v2160_v9  ;;  %vm384_vm7 = vcmp.eq.s32.totalorder %v367_v50, %v2164_v11  ;;  %vm381_vm8 = vcmp.eq.s32.totalorder %v367_v50, %v2158_v8 }
 0x117   : > { %v1548_v54 = vsel %vm382_vm6, 1.0, %v1934_v41  ;;  %v1547_v55 = vsel %vm381_vm8, 1.0, %v1934_v41  ;;  %vm383_vm9 = vcmp.eq.s32.totalorder %v367_v50, %v2162_v10  ;;  %v1550_v60 = vsel %vm384_vm7, 1.0, %v1934_v41 }
 0x118   : > { %v380_v56 = vadd.s32 %v379_v53, %v377_v52  ;;  %v2204_v57 = vsub.f32 %v1547_v55, %v1547_v55  ;;  %v2207_v59 = vsub.f32 %v1548_v54, %v1548_v54  ;;  %v1549_v61 = vsel %vm383_vm9, 1.0, %v1934_v41 }
 0x119   : > { %v2262_v15 = vsub.f32 %v1549_v61, %v1549_v61  ;;  %v1394_v61 = vld [vmem:[%s2177_s13 + $0x18] sm:$0xff] }
 0x11a   : > { %vm386_vm11 = vcmp.eq.s32.totalorder %v380_v56, %v2160_v9  ;;  %vm388_vm12 = vcmp.eq.s32.totalorder %v380_v56, %v2164_v11  ;;  %vm385_vm13 = vcmp.eq.s32.totalorder %v380_v56, %v2158_v8  ;;  %v497_v62 = vand.u32 4294901760, %v2204_v57 }
 0x11b   : > { %v345_v63 = vpop.permute.xlu0 %344  ;;  %v1552_v0 = vsel %vm386_vm11, 1.0, %v1934_v41  ;;  %vm2222_vm14 = vmpackc.low %vm386_vm11, %vm382_vm6  ;;  %v1554_v2 = vsel %vm388_vm12, 1.0, %v1934_v41  ;;  %v1551_v3 = vsel %vm385_vm13, 1.0, %v1934_v41  ;;  %vm387_vm15 = vcmp.eq.s32.totalorder %v380_v56, %v2162_v10 }
 0x11c   : > { %v347_v4 = vmul.f32 %v345_v63, %v341_v58  ;;  %1585 = vmatprep.subr.msk.bf16.mxu0 %vm2222_vm14, %v1935_v5  ;;  %v2234_v6 = vsub.f32 %v1552_v0, %v1552_v0  ;;  %vm2238_vm0 = vmpackc.low %vm388_vm12, %vm384_vm7  ;;  %v2242_v9 = vsub.f32 %v1550_v60, %v1550_v60  ;;  %v2244_v12 = vsub.f32 %v1554_v2, %v1554_v2  ;;  %v1392_v60 = vld [vmem:[%s2177_s13 + $0x8] sm:$0xff] }
 0x11d   : > { %1609 = vmatprep.subr.msk.bf16.mxu1 %vm2238_vm0, %v1935_v5  ;;  %vm2253_vm1 = vmpackc.low %vm385_vm13, %vm381_vm8  ;;  %v2257_v11 = vsub.f32 %v1551_v3, %v1551_v3  ;;  %v1553_v14 = vsel %vm387_vm15, 1.0, %v1934_v41  ;;  %v491_v16 = vand.u32 4294901760, %v2207_v59  ;;  %v498_v8 = vsub.f32 %v2204_v57, %v497_v62 }
 0x11e   : > { %v407_v17 = vsel %vm405_vm10, %v347_v4, 0  ;;  %1587 = vmatpush1.bf16.msk.msra.mxu0 %vm2253_vm1, %v1935_v5  ;;  %vm2276_vm2 = vmpackc.low %vm387_vm15, %vm383_vm9  ;;  %v2280_v19 = vsub.f32 %v1553_v14, %v1553_v14  ;;  %v503_v20 = vand.u32 4294901760, %v2234_v6  ;;  %v988_v23 = vand.u32 4294901760, %v2262_v15 }
 0x11f   : > { %v2283_v21 = vand.u32 4294901760, %v407_v17  ;;  %v509_v22 = vand.u32 4294901760, %v2257_v11  ;;  %1611 = vmatpush1.bf16.msk.msra.mxu1 %vm2276_vm2, %v1935_v5  ;;  %v492_v10 = vsub.f32 %v2207_v59, %v491_v16  ;;  %v982_v26 = vand.u32 4294901760, %v2242_v9 }
 0x120   : > { %v1000_v24 = vand.u32 4294901760, %v2280_v19  ;;  %v504_v25 = vsub.f32 %v2234_v6, %v503_v20  ;;  %v994_v27 = vand.u32 4294901760, %v2244_v12  ;;  %v989_v30 = vsub.f32 %v2262_v15, %v988_v23 }
 0x121   : > { %v479_v28 = vsub.f32 %v407_v17, %v2283_v21  ;;  %v510_v29 = vsub.f32 %v2257_v11, %v509_v22  ;;  %v493_v31 = vand.u32 4294901760, %v492_v10  ;;  %v983_v34 = vsub.f32 %v2242_v9, %v982_v26 }
 0x122   : > { %v1001_v32 = vsub.f32 %v2280_v19, %v1000_v24  ;;  %v505_v33 = vand.u32 4294901760, %v504_v25  ;;  %v995_v35 = vsub.f32 %v2244_v12, %v994_v27  ;;  %v499_v44 = vand.u32 4294901760, %v498_v8 }
 0x123   : > { %v511_v36 = vand.u32 4294901760, %v510_v29  ;;  %v480_v37 = vand.u32 4294901760, %v479_v28  ;;  %v984_v40 = vand.u32 4294901760, %v983_v34  ;;  %v990_v45 = vand.u32 4294901760, %v989_v30 }
 0x124   : > { %v1002_v38 = vand.u32 4294901760, %v1001_v32  ;;  %v1588_v39 = vpack.c.bf16 %v505_v33, %v493_v31  ;;  %v996_v42 = vand.u32 4294901760, %v995_v35  ;;  %v1592_v50 = vpack.c.bf16 %v2234_v6, %v2207_v59  ;;  %v1393_v59 = vld [vmem:[%s2177_s13 + $0x10] sm:$0xff] }
 0x125   : > { %v481_v43 = vsub.f32 %v479_v28, %v480_v37  ;;  %v1590_v48 = vpack.c.bf16 %v511_v36, %v499_v44  ;;  %v1616_v51 = vpack.c.bf16 %v2244_v12, %v2242_v9  ;;  %v1594_v52 = vpack.c.bf16 %v2257_v11, %v2204_v57  ;;  %v1391_v57 = vld [vmem:[%s2177_s13] sm:$0xff] }
 0x126   : > { %1589 = vmatprep.subr.bf16.mxu0 %v1588_v39  ;;  %v1612_v46 = vpack.c.bf16 %v996_v42, %v984_v40  ;;  %v1614_v49 = vpack.c.bf16 %v1002_v38, %v990_v45  ;;  %v1618_v53 = vpack.c.bf16 %v2280_v19, %v2262_v15  ;;  %v1600_v54 = vpack.c.bf16 %v503_v20, %v491_v16 }
 0x127   : > { %v482_v47 = vand.u32 4294901760, %v481_v43  ;;  %v1624_v55 = vpack.c.bf16 %v994_v27, %v982_v26  ;;  %v1602_v56 = vpack.c.bf16 %v509_v22, %v497_v62  ;;  %v1626_v58 = vpack.c.bf16 %v1000_v24, %v988_v23 }
 0x128   : > { %1613 = vmatprep.subr.bf16.mxu1 %v1612_v46 }
 0x129   : > { %483 = vmatmul.mubr.f32.vlgmr.msra.gmra.mrb[0].mxu0 %v482_v47  ;;  %974 = vmatmul.mubr.f32.vlgmr.msra.gmra.mrb[0].mxu1 %v482_v47 }
 0x12a   : > { %1591 = vmatpush1.bf16.msra.mxu0 %v1590_v48  ;;  %1615 = vmatpush1.bf16.msra.mxu1 %v1614_v49 }
 0x12b   : > { %1593 = vmatprep.subr.bf16.mxu0 %v1592_v50  ;;  %1617 = vmatprep.subr.bf16.mxu1 %v1616_v51 }
 0x12c   : > { %573 = vmatprep.mubr.f32.mxu0 %v1934_v41  ;;  %1064 = vmatprep.mubr.f32.mxu1 %v1934_v41 }
 0x131   : > { %575 = vmatmul.mubr.f32.vlgmr.msra.gmra.mrb[0].mxu0 %v2283_v21  ;;  %1066 = vmatmul.mubr.f32.vlgmr.msra.gmra.mrb[0].mxu1 %v2283_v21 }
 0x132   : > { %1595 = vmatpush1.bf16.msra.mxu0 %v1594_v52  ;;  %1619 = vmatpush1.bf16.msra.mxu1 %v1618_v53 }
 0x133   : > { %1597 = vmatprep.subr.msk.bf16.mxu0 %vm2222_vm14, %v1935_v5  ;;  %1621 = vmatprep.subr.msk.bf16.mxu1 %vm2238_vm0, %v1935_v5 }
 0x134   : > { %653 = vmatprep.mubr.f32.mxu0 %v1934_v41  ;;  %1144 = vmatprep.mubr.f32.mxu1 %v1934_v41 }
 0x139   : > { %656 = vmatmul.mubr.f32.vlgmr.msra.gmra.mrb[0].mxu0 %v479_v28  ;;  %1147 = vmatmul.mubr.f32.vlgmr.msra.gmra.mrb[0].mxu1 %v479_v28 }
 0x13a   : > { %1599 = vmatpush1.bf16.msk.msra.mxu0 %vm2253_vm1, %v1935_v5  ;;  %1623 = vmatpush1.bf16.msk.msra.mxu1 %vm2276_vm2, %v1935_v5 }
 0x13b   : > { %1601 = vmatprep.subr.bf16.mxu0 %v1600_v54  ;;  %1625 = vmatprep.subr.bf16.mxu1 %v1624_v55 }
 0x13c   : > { %730 = vmatprep.mubr.f32.mxu0 %v1934_v41  ;;  %1221 = vmatprep.mubr.f32.mxu1 %v1934_v41 }
 0x141   : > { %734 = vmatmul.mubr.f32.vlgmr.msra.gmra.mrb[0].mxu0 %v480_v37  ;;  %1225 = vmatmul.mubr.f32.vlgmr.msra.gmra.mrb[0].mxu1 %v480_v37 }
 0x142   : > { %1603 = vmatpush1.bf16.msra.mxu0 %v1602_v56  ;;  %1627 = vmatpush1.bf16.msra.mxu1 %v1626_v58 }
 0x143   : > { %1605 = vmatprep.subr.msk.bf16.mxu0 %vm2222_vm14, %v1935_v5  ;;  %1629 = vmatprep.subr.msk.bf16.mxu1 %vm2238_vm0, %v1935_v5 }
 0x144   : > { %816 = vmatprep.mubr.f32.mxu0 %v1934_v41  ;;  %1307 = vmatprep.mubr.f32.mxu1 %v1934_v41 }
 0x149   : > { %818 = vmatmul.mubr.f32.vlgmr.msra.gmra.mrb[0].mxu0 %v2283_v21  ;;  %1309 = vmatmul.mubr.f32.vlgmr.msra.gmra.mrb[0].mxu1 %v2283_v21 }
 0x14a   : > { %1607 = vmatpush1.bf16.msk.msra.mxu0 %vm2253_vm1, %v1935_v5  ;;  %1631 = vmatpush1.bf16.msk.msra.mxu1 %vm2276_vm2, %v1935_v5 }
 0x14b   : > { %892 = vmatprep.mubr.f32.mxu0 %v1934_v41  ;;  %1383 = vmatprep.mubr.f32.mxu1 %v1934_v41 }
 0x151   : > { %894 = vmatmul.mubr.f32.vlgmr.msra.gmra.mrb[0].mxu0 %v2283_v21  ;;  %1385 = vmatmul.mubr.f32.vlgmr.msra.gmra.mrb[0].mxu1 %v2283_v21 }
 0x224   : > { %v895_v62 = vpop.f32.mrb[0].mxu0  ;;  %v1386_v63 = vpop.f32.mrb[0].mxu1 }
 0x225   : > { %v1395_v0 = vadd.f32 %v1391_v57, %v895_v62  ;;  %v1397_v1 = vadd.f32 %v1393_v59, %v1386_v63  ;;  %v897_v2 = vpop.f32.mrb[1].mxu0  ;;  %v1388_v3 = vpop.f32.mrb[1].mxu1 }
 0x226   : > { %v1396_v4 = vadd.f32 %v1392_v60, %v897_v2  ;;  %v1398_v5 = vadd.f32 %v1394_v61, %v1388_v3 }
 0x227   : > { %1399 = vst [vmem:[%s2177_s13] sm:$0xff] %v1395_v0  ;;  %1401 = vst [vmem:[%s2177_s13 + $0x10] sm:$0xff] %v1397_v1 }
 0x228   : > { %1400 = vst [vmem:[%s2177_s13 + $0x8] sm:$0xff] %v1396_v4  ;;  %1402 = vst [vmem:[%s2177_s13 + $0x18] sm:$0xff] %v1398_v5 }
 0x229 PF: > { %s1580_s8 = sshll.u32 %s1912_s28, 2  ;;  %s1652_s20 = smul.u32 12, %s1916_s29 }
 0x22a   : > { %s1420_s21 = sshll.u32 %s2177_s13, 4  ;;  %s1404_s22 = scalar_lea.sflag [#allocation6], %s268_s30  ;;  %s2362_s21 = int_to_ptr.vmem [resolvable:$true] %s1420_s21 }
 0x22b   : > { %s1416_s9 = sadd.s32 %s1652_s20, %s1580_s8  ;;  %s1804_s10 = scalar_lea.vmem %s2362_s21, 512 }
 0x22c   : > { %s1581_s11 = sshll.u32 %s1416_s9, 7  ;;  %p1805_p9 = scmp.ne.s32.totalorder %s2362_s21, %s1804_s10 }
 0x22d   : > { %s1418_s27 = scalar_lea.hbm %s2427_s5, %s1581_s11  ;;  %p2453_p10 = scmp.ne.s32.totalorder %s2440_s17, 0 }
 0x22e   : > { %s1936_s28 = smov [#allocation7]  }
 0x22f   : > { %p1806_p3 = pnand %p1805_p9, %p2453_p10  ;;  %s1808_s29 = sshll.u32 %s1936_s28, 4  ;;  %s1809_s29 = int_to_ptr.vmem [resolvable:$false] %s1808_s29 }
 0x230   : > { %s1810_s13 = scalar_lea.vmem %s1809_s29, 1024  ;;  %p1811_p0 = scmp.lt.s32.totalorder %s2362_s21, %s1809_s29 }
 0x231   : > { %p1807_p8 = pneg %p1806_p3  ;;  %p1812_p2 = scmp.lt.s32.totalorder %s1810_s13, %s1804_s10 }
 0x233   : > { %p1813_p4 = por %p1812_p2, %p1811_p0 }
 0x235   : > { %p1814_p5 = pnand %p1813_p4, %p1807_p8 }
 0x237   : > { %1817 = shalt.err (!%p1814_p5)
}
 0x238   : > { %s1818_s18 = scalar_lea.hbm %s1418_s27, 512  ;;  %s1822_s19 = scalar_lea.hbm %s2427_s5, 6144 }
 0x239   : > { %p1819_p7 = scmp.ne.s32.totalorder %s1418_s27, %s1818_s18  ;;  %p1823_p12 = scmp.lt.u32.totalorder %s1418_s27, %s2427_s5 }
 0x23a   : > { %p1824_p6 = scmp.lt.u32.totalorder %s1822_s19, %s1818_s18  ;;  %p1826_p9 = scmp.lt.u32.totalorder %s1818_s18, %s1418_s27 }
 0x23b   : > { %p1820_p11 = pnand %p1819_p7, %p2453_p10 }
 0x23c   : > { %p1825_p1 = por %p1824_p6, %p1823_p12 }
 0x23d   : > { %p1821_p13 = pneg %p1820_p11 }
 0x23e   : > { %p1827_p3 = por %p1826_p9, %p1825_p1 }
 0x240   : > { %p1828_p8 = pnand %p1827_p3, %p1821_p13 }
 0x242   : > { %1831 = shalt.err (!%p1828_p8)
}
 0x243   : > { %1655 = dma.vmem_to_hbm [thread:$0]  (%p2453_p10), %s2362_s21, 512, %s1418_s27, %s1404_s22  }
 0x244 PF: > { %p1666_p0 = scmp.ge.s32.totalorder %s1928_s7, 2  ;;  %s1432_s9 = sand.u32 1, %s1888_s23  }
 0x245   : > { %p2454_p2 = scmp.ne.s32.totalorder %s2441_s12, 0  ;;  %s1433_s11 = scalar_lea.sflag [#allocation6], %s1432_s9 }
 0x247   : > { %p1662_p4 = pnand %p1666_p0, %p2454_p2 }
 0x249   : > { %1883 = dma.done.wait (!%p1662_p4), %s1433_s11, 512  }
 0x24a   : > { %1885 = vsyncadd (!%p1662_p4), %s1433_s11, 4294966784  ;;  %s27_s7 = sadd.s32 1, %s1928_s7   ;;  %s2455_s17 = sld [smem:[#allocation11_spill]] }
 0x24b   : > { %p24_p5 = scmp.ge.s32.totalorder %s27_s7, 14   ;;  %s2456_s27 = sld [smem:[#allocation15_spill]] }
 0x24c   : > { %s2457_s28 = sld [smem:[#allocation12_spill]]  ;;  %s2458_s30 = sld [smem:[#allocation13_spill]] }
 0x24d   : > { %s2459_s21 = sld [smem:[#allocation14_spill]]  ;;  %s2460_s23 = smov %s1892_s0 }
 0x24e   : > { %s2461_s0 = smov %s1896_s24  ;;  %s2462_s24 = smov %s2072_s14 }
 0x24f   : > { %s2463_s25 = smov %s1904_s26  ;;  %s2465_s29 = smov %s1924_s6 }
 0x250   : > { %s2464_s26 = smov %s2455_s17  ;;  %26 = sbr.rel (!%p24_p5) target bundleno = 24 (0x18), region = 91 }
 0x253   : > { %s2466_s6 = smov %s2459_s21 }
 0x257   :  { %1438 = vsyncpa [#allocation5], 1 }
 0x258   :  { %1440 = vsyncpa [#allocation5 + $0x1], 1 }
 0x259   :  { %1441 = vsyncpa [#allocation6], 1 }
 0x25a   :  { %1443 = vsyncpa [#allocation6 + $0x1], 1 }

</bundles_post_ra>
